<compile_context>
chip_gen: v6e
topology: v6e:2x2x1
jax: 0.10.0
libtpu: 0.0.40
codegen_flags: <defaults>
</compile_context>

<pallas_src>
import functools

import jax
import jax.numpy as jnp
from jax import lax
from jax.experimental import pallas as pl
from jax.experimental.pallas import tpu as pltpu

_LANES = 128
_SUBLANES = 8
_MIN_TILE = _SUBLANES * _LANES        # 1024-element (8,128) f32 alignment unit
_MAX_TILE_ROWS = 1024                 # (1024,128) f32 = 512 KiB per input per buffer


def _fused_vqvae_loss_kernel(n_valid, tile_rows,
                             emb_ref, x_ref, xhat_ref, out_ref, acc_ref):
    """Fused MSE reduction + scalar tail.

    emb_ref : (1,1) f32 SMEM   -- embedding_loss (runtime scalar)
    x_ref   : (tile_rows,128)  -- block of flattened x
    xhat_ref: (tile_rows,128)  -- block of flattened x_hat
    out_ref : (1,3) f32 SMEM   -- [recon_loss, embedding_loss, loss]
    acc_ref : (1,128) f32 VMEM -- per-lane partial-sum accumulator
    """
    i = pl.program_id(0)
    last = pl.num_programs(0) - 1

    @pl.when(i == 0)
    def _init():
        acc_ref[...] = jnp.zeros_like(acc_ref)

    # Mask against the true (unpadded) element count: out-of-bounds rows of a
    # partial final block and any alignment padding contribute exactly zero.
    row = lax.broadcasted_iota(jnp.int32, (tile_rows, _LANES), 0) + i * tile_rows
    lane = lax.broadcasted_iota(jnp.int32, (tile_rows, _LANES), 1)
    flat_idx = row * _LANES + lane
    d = jnp.where(flat_idx < n_valid, x_ref[...] - xhat_ref[...], 0.0)

    # Stage 1: sublane-axis reduction per tile, accumulated per-lane (VPU).
    acc_ref[...] += jnp.sum(d * d, axis=0, keepdims=True)

    @pl.when(i == last)
    def _finalize():
        # Stage 2: single cross-lane reduce + scalar tail, done once.
        sq_sum = jnp.sum(acc_ref[...])
        recon = sq_sum * (1.0 / n_valid)          # mean reduction (nn.MSELoss)
        emb = emb_ref[0, 0]
        out_ref[0, 0] = recon
        out_ref[0, 1] = emb
        out_ref[0, 2] = recon + emb


def _as_slab2d(a):
    """Flatten to a lane-dense (rows, 128) f32 slab.

    The reshape is free for contiguous inputs; a zero pad (full copy) is only
    emitted when the flat size is not a multiple of 8*128 — not the case for
    the demo shapes.  Pad values are masked out in-kernel regardless.
    """
    flat = jnp.ravel(a).astype(jnp.float32)
    n = flat.shape[0]
    padded = pl.cdiv(n, _MIN_TILE) * _MIN_TILE
    if padded != n:
        flat = jnp.pad(flat, (0, padded - n))
    return flat.reshape(padded // _LANES, _LANES)


def vqvae_loss(data, output):
    """Pallas implementation of VQVAE_loss.forward."""
    x = output["x"]
    x_hat = output["x_hat"]
    del data  # input_block unused by the default mse_fn (see TODO above)

    emb = jnp.asarray(output["embedding_loss"], jnp.float32).reshape(1, 1)

    n = x.size
    x2d = _as_slab2d(x)
    xhat2d = _as_slab2d(x_hat)
    rows = x2d.shape[0]

    # Tile budget: 2 inputs x 2 pipeline buffers x tile_rows*128*4B <= 2 MiB,
    # safe on v5e (16 MiB scoped default), v6e (32 MiB) and v7x (32 MiB).
    tile_rows = min(_MAX_TILE_ROWS, rows)
    grid = (pl.cdiv(rows, tile_rows),)

    kernel = functools.partial(_fused_vqvae_loss_kernel, n, tile_rows)

    out = pl.pallas_call(
        kernel,
        out_shape=jax.ShapeDtypeStruct((1, 3), jnp.float32),
        grid_spec=pltpu.PrefetchScalarGridSpec(
            num_scalar_prefetch=0,
            grid=grid,
            in_specs=[
                # embedding_loss scalar, resident in SMEM across the grid.
                pl.BlockSpec((1, 1), lambda i: (0, 0),
                             memory_space=pltpu.MemorySpace.SMEM),
                pl.BlockSpec((tile_rows, _LANES), lambda i: (i, 0)),   # x
                pl.BlockSpec((tile_rows, _LANES), lambda i: (i, 0)),   # x_hat
            ],
            out_specs=pl.BlockSpec((1, 3), lambda i: (0, 0),
                                   memory_space=pltpu.MemorySpace.SMEM),
            scratch_shapes=[pltpu.VMEM((1, _LANES), jnp.float32)],
        ),
        # Reduction axis -> "arbitrary" (accumulator carried across steps).
        # TODO(synk): for multi-MB inputs on v7x, add a leading 2-way
        # "parallel" split across the two TensorCores with two partial sums.
        compiler_params=pltpu.CompilerParams(
            dimension_semantics=("arbitrary",),
        ),
        cost_estimate=pl.CostEstimate(
            flops=3 * n, transcendentals=0, bytes_accessed=8 * n + 16),
    )(emb, x2d, xhat2d)

    recon_loss = out[0, 0]
    embedding_loss = out[0, 1]
    loss = out[0, 2]
    return {"loss": loss, "recon_loss": recon_loss,
            "embedding_loss": embedding_loss}


# ---------------------------------------------------------------------------
# Pure-JAX reference (sanity check only)
# ---------------------------------------------------------------------------
def _reference(data, output):
    del data
    x = output["x"].astype(jnp.float32)
    x_hat = output["x_hat"].astype(jnp.float32)
    recon = jnp.mean((x - x_hat) ** 2)
    emb = jnp.asarray(output["embedding_loss"], jnp.float32)
    return {"loss": recon + emb, "recon_loss": recon, "embedding_loss": emb}


if __name__ == "__main__":
    key = jax.random.PRNGKey(0)
    k1, k2, k3, k4 = jax.random.split(key, 4)

    # Small NCHW shapes consistent with a VQ-VAE compression model's outputs.
    x = jax.random.normal(k1, (2, 4, 16, 16), dtype=jnp.float32)
    x_hat = x + 0.1 * jax.random.normal(k2, (2, 4, 16, 16), dtype=jnp.float32)
    input_block = jax.random.normal(k3, (2, 4, 16, 16), dtype=jnp.float32)
    embedding_loss = 0.25 * jnp.abs(jax.random.normal(k4, (), dtype=jnp.float32))

    data = {"input_block": input_block}
    output = {"x": x, "x_hat": x_hat, "embedding_loss": embedding_loss}

    out = vqvae_loss(data, output)
    out = jax.tree_util.tree_map(jax.block_until_ready, out)

    ref = _reference(data, output)
    for k in ("recon_loss", "embedding_loss", "loss"):
        assert jnp.allclose(out[k], ref[k], rtol=1e-5, atol=1e-6), (
            k, out[k], ref[k])

    print("KERNEL_OK")
</pallas_src>

<mosaic_0001>
module attributes {stable_mosaic.version = 11 : i64} {
  func.func @_fused_vqvae_loss_kernel(%arg0: i32, %arg1: memref<1x1xf32, #tpu.memory_space<smem>>, %arg2: memref<16x128xf32, #tpu.memory_space<vmem>>, %arg3: memref<16x128xf32, #tpu.memory_space<vmem>>, %arg4: memref<1x3xf32, #tpu.memory_space<smem>>, %arg5: memref<1x128xf32, #tpu.memory_space<vmem>>) attributes {dimension_semantics = [#tpu.dimension_semantics<arbitrary>], iteration_bounds = array<i64: 1>, scalar_prefetch = 0 : i64, scratch_operands = 1 : i64, tpu.core_type = #tpu.core_type<tc>, window_params = [{transform_indices = @transform_0, window_bounds = array<i64: 1, 1>}, {transform_indices = @transform_1, window_bounds = array<i64: 16, 128>}, {transform_indices = @transform_2, window_bounds = array<i64: 16, 128>}, {transform_indices = @transform_3, window_bounds = array<i64: 1, 3>}]} {
    %c0_i32 = arith.constant 0 : i32
    %0 = arith.cmpi eq, %arg0, %c0_i32 : i32
    %1 = arith.extui %0 : i1 to i32
    %c0_i32_0 = arith.constant 0 : i32
    %2 = arith.cmpi ne, %1, %c0_i32_0 : i32
    scf.if %2 {
      %cst_11 = arith.constant 0.000000e+00 : f32
      %27 = vector.broadcast %cst_11 : f32 to vector<1x128xf32>
      %c0_12 = arith.constant 0 : index
      %c0_13 = arith.constant 0 : index
      %28 = vector.load %arg5[%c0_12, %c0_13] : memref<1x128xf32, #tpu.memory_space<vmem>>, vector<1x128xf32>
      tpu.vector_store %arg5[%c0_12, %c0_13], %27 {strides = array<i32>} : memref<1x128xf32, #tpu.memory_space<vmem>>, vector<1x128xf32>,
    } else {
    }
    %3 = tpu.iota {dimensions = array<i32: 0>} : vector<16x128xi32>
    %c16_i32 = arith.constant 16 : i32
    %4 = arith.muli %arg0, %c16_i32 : i32
    %5 = vector.broadcast %4 : i32 to vector<16x128xi32>
    %6 = arith.addi %3, %5 : vector<16x128xi32>
    %7 = tpu.iota {dimensions = array<i32: 1>} : vector<16x128xi32>
    %c128_i32 = arith.constant 128 : i32
    %8 = vector.broadcast %c128_i32 : i32 to vector<16x128xi32>
    %9 = arith.muli %6, %8 : vector<16x128xi32>
    %10 = arith.addi %9, %7 : vector<16x128xi32>
    %c2048_i32 = arith.constant 2048 : i32
    %11 = vector.broadcast %c2048_i32 : i32 to vector<16x128xi32>
    %12 = arith.cmpi slt, %10, %11 : vector<16x128xi32>
    %c0 = arith.constant 0 : index
    %c0_1 = arith.constant 0 : index
    %13 = vector.load %arg2[%c0, %c0_1] : memref<16x128xf32, #tpu.memory_space<vmem>>, vector<16x128xf32>
    %c0_2 = arith.constant 0 : index
    %c0_3 = arith.constant 0 : index
    %14 = vector.load %arg3[%c0_2, %c0_3] : memref<16x128xf32, #tpu.memory_space<vmem>>, vector<16x128xf32>
    %15 = arith.subf %13, %14 : vector<16x128xf32>
    %cst = arith.constant 0.000000e+00 : f32
    %16 = vector.broadcast %cst : f32 to vector<16x128xf32>
    %17 = arith.select %12, %15, %16 : vector<16x128xi1>, vector<16x128xf32>
    %c0_4 = arith.constant 0 : index
    %c0_5 = arith.constant 0 : index
    %18 = vector.load %arg5[%c0_4, %c0_5] : memref<1x128xf32, #tpu.memory_space<vmem>>, vector<1x128xf32>
    %19 = arith.mulf %17, %17 : vector<16x128xf32>
    %cst_6 = arith.constant dense<0.000000e+00> : vector<128xf32>
    %20 = vector.multi_reduction <add>, %19, %cst_6 [0] : vector<16x128xf32> to vector<128xf32>
    %21 = vector.shape_cast %20 : vector<128xf32> to vector<1x128xf32>
    %22 = arith.addf %18, %21 : vector<1x128xf32>
    %c0_7 = arith.constant 0 : index
    %c0_8 = arith.constant 0 : index
    %23 = vector.load %arg5[%c0_7, %c0_8] : memref<1x128xf32, #tpu.memory_space<vmem>>, vector<1x128xf32>
    tpu.vector_store %arg5[%c0_7, %c0_8], %22 {strides = array<i32>} : memref<1x128xf32, #tpu.memory_space<vmem>>, vector<1x128xf32>,
    %c0_i32_9 = arith.constant 0 : i32
    %24 = arith.cmpi eq, %arg0, %c0_i32_9 : i32
    %25 = arith.extui %24 : i1 to i32
    %c0_i32_10 = arith.constant 0 : i32
    %26 = arith.cmpi ne, %25, %c0_i32_10 : i32
    scf.if %26 {
      %c0_11 = arith.constant 0 : index
      %c0_12 = arith.constant 0 : index
      %27 = vector.load %arg5[%c0_11, %c0_12] : memref<1x128xf32, #tpu.memory_space<vmem>>, vector<1x128xf32>
      %28 = vector.shape_cast %27 : vector<1x128xf32> to vector<1x1x128xf32>
      %cst_13 = arith.constant dense<0.000000e+00> : vector<1xf32>
      %29 = vector.multi_reduction <add>, %28, %cst_13 [1, 2] : vector<1x1x128xf32> to vector<1xf32>
      %30 = vector.shape_cast %29 : vector<1xf32> to vector<1x1x1xf32>
      %31 = vector.extract %30[0, 0, 0] : f32 from vector<1x1x1xf32>
      %cst_14 = arith.constant 4.8828125E-4 : f32
      %32 = arith.mulf %31, %cst_14 : f32
      %c0_15 = arith.constant 0 : index
      %c0_16 = arith.constant 0 : index
      %33 = memref.load %arg1[%c0_15, %c0_16] : memref<1x1xf32, #tpu.memory_space<smem>>
      %c0_17 = arith.constant 0 : index
      %c0_18 = arith.constant 0 : index
      %34 = memref.load %arg4[%c0_17, %c0_18] : memref<1x3xf32, #tpu.memory_space<smem>>
      memref.store %32, %arg4[%c0_17, %c0_18] : memref<1x3xf32, #tpu.memory_space<smem>>
      %c0_19 = arith.constant 0 : index
      %c1 = arith.constant 1 : index
      %35 = memref.load %arg4[%c0_19, %c1] : memref<1x3xf32, #tpu.memory_space<smem>>
      memref.store %33, %arg4[%c0_19, %c1] : memref<1x3xf32, #tpu.memory_space<smem>>
      %36 = arith.addf %32, %33 : f32
      %c0_20 = arith.constant 0 : index
      %c2 = arith.constant 2 : index
      %37 = memref.load %arg4[%c0_20, %c2] : memref<1x3xf32, #tpu.memory_space<smem>>
      memref.store %36, %arg4[%c0_20, %c2] : memref<1x3xf32, #tpu.memory_space<smem>>
    } else {
    }
    return
  }
  func.func @transform_0(%arg0: i32) -> (i32, i32) {
    %c0_i32 = arith.constant 0 : i32
    %c0_i32_0 = arith.constant 0 : i32
    %c0_i32_1 = arith.constant 0 : i32
    return %c0_i32, %c0_i32_0 : i32, i32
  }
  func.func @transform_1(%arg0: i32) -> (i32, i32) {
    %c0_i32 = arith.constant 0 : i32
    %c0_i32_0 = arith.constant 0 : i32
    return %arg0, %c0_i32 : i32, i32
  }
  func.func @transform_2(%arg0: i32) -> (i32, i32) {
    %c0_i32 = arith.constant 0 : i32
    %c0_i32_0 = arith.constant 0 : i32
    return %arg0, %c0_i32 : i32, i32
  }
  func.func @transform_3(%arg0: i32) -> (i32, i32) {
    %c0_i32 = arith.constant 0 : i32
    %c0_i32_0 = arith.constant 0 : i32
    %c0_i32_1 = arith.constant 0 : i32
    return %c0_i32, %c0_i32_0 : i32, i32
  }
}

</mosaic_0001>

<bundles_post_ra>
// kernel: tpu_custom_call.1
= control target key start
LH: loop header
LB: loop body
LE: loop exit
PB: predicated region body
PF: predicated region fallthrough
CT: control target
= control target key end

     0   :  { %9 = vsyncpa [#allocation5], 0  ;;  %s226_s0 = inlined_call_operand.<no memory space> [shape: f32[1,1], index: 0, kind: input, shape index: {}]   ;;  %s227_s1 = inlined_call_operand.hbm [shape: f32[16,128], index: 1, kind: input, shape index: {}]   ;;  %s228_s2 = inlined_call_operand.hbm [shape: f32[16,128], index: 2, kind: input, shape index: {}]   ;;  %s229_s3 = inlined_call_operand.hbm [shape: f32[1,3], index: 3, kind: output, shape index: {}]  }
   0x1   :  { %10 = vsyncpa [#allocation8], 0 }
   0x2   :  { %11 = vsyncpa [#allocation6], 0  ;;  %s185_s12 = smov [#allocation4]  }
   0x3   :  { %s19_s13 = sshll.u32 %s185_s12, 4  ;;  %s20_s13 = int_to_ptr.vmem [resolvable:$true] %s19_s13 }
   0x4   :  { %s139_s14 = scalar_lea.vmem %s20_s13, 256  ;;  %p144_p1 = scmp.lt.s32.totalorder %s20_s13, %s20_s13 }
   0x5   :  { %p140_p0 = scmp.ne.s32.totalorder %s20_s13, %s139_s14  ;;  %p145_p2 = scmp.lt.s32.totalorder %s139_s14, %s139_s14 }
   0x7   :  { %p146_p3 = por %p145_p2, %p144_p1 }
   0x9   :  { %p147_p4 = pnand %p146_p3, %p140_p0 }
   0xb   :  { %150 = shalt.err (!%p147_p4)
}
   0xc   :  { %s186_s15 = smov 128   ;;  %s187_s16 = smov 8  }
   0xd   :  { %25 = dma.hbm_to_vmem [thread:$0]  %s227_s1, 256, %s20_s13, [#allocation5], %s186_s15, %s186_s15, %s187_s16  }
   0xe   :  { %s188_s19 = smov [#allocation7]  }
   0xf   :  { %s31_s20 = sshll.u32 %s188_s19, 4  ;;  %s32_s20 = int_to_ptr.vmem [resolvable:$true] %s31_s20 }
  0x10   :  { %s159_s21 = scalar_lea.vmem %s32_s20, 256  ;;  %p164_p6 = scmp.lt.s32.totalorder %s32_s20, %s32_s20 }
  0x11   :  { %p160_p5 = scmp.ne.s32.totalorder %s32_s20, %s159_s21  ;;  %p165_p7 = scmp.lt.s32.totalorder %s159_s21, %s159_s21 }
  0x13   :  { %p166_p8 = por %p165_p7, %p164_p6 }
  0x15   :  { %p167_p9 = pnand %p166_p8, %p160_p5 }
  0x17   :  { %170 = shalt.err (!%p167_p9)
}
  0x18   :  { %37 = dma.hbm_to_vmem [thread:$0]  %s228_s2, 256, %s32_s20, [#allocation8], %s186_s15, %s186_s15, %s187_s16  }
  0x19   :  { %179 = dma.done.wait [#allocation5], 256  }
  0x1a   :  { %180 = vsyncadd [#allocation5], 4294967040 }
  0x1b   :  { %181 = dma.done.wait [#allocation8], 256  }
  0x1c   :  { %182 = vsyncadd [#allocation8], 4294967040  ;;  %v49_v0 = vlaneseq  ;;  %v189_v1 = vmov 0.0   ;;  %104 = sst [smem:[#allocation9 + $0x1]] %s226_s0  ;;  %v64_v8 = vld [vmem:[#allocation4] sm:$0xff]  ;;  %v65_v9 = vld [vmem:[#allocation4 + $0x8] sm:$0xff] }
  0x1d   :  { %48 = vst [vmem:[#allocation2] sm:$0x1] %v189_v1  ;;  %v66_v10 = vld [vmem:[#allocation7] sm:$0xff]  ;;  %v67_v12 = vld [vmem:[#allocation7 + $0x8] sm:$0xff]  ;;  %vm88_vm2 = vcmask 1040384   ;;  %s190_s29 = smov [#allocation9]  }
  0x1e   :  { %v50_v2 = vshrl.u32 %v49_v0, 7  ;;  %v57_v3 = vand.u32 127, %v49_v0  ;;  %v68_v13 = vsub.f32 %v64_v8, %v66_v10  ;;  %v69_v14 = vsub.f32 %v65_v9, %v67_v12 }
  0x20   :  { %v51_v4 = vadd.s32 8, %v50_v2  ;;  %v58_v5 = vmul.u32 128, %v50_v2 }
  0x22   :  { %v59_v6 = vmul.u32 128, %v51_v4  ;;  %v60_v7 = vadd.s32 %v58_v5, %v57_v3 }
  0x24   :  { %v61_v11 = vadd.s32 %v59_v6, %v57_v3  ;;  %vm62_vm0 = vcmp.lt.s32.totalorder %v60_v7, 2048  ;;  %v72_v25 = vld [vmem:[#allocation2] sm:$0x1] }
  0x25   :  { %v70_v15 = vsel %vm62_vm0, %v68_v13, 0.0 }
  0x26   :  { %vm63_vm1 = vcmp.lt.s32.totalorder %v61_v11, 2048  ;;  %v73_v17 = vmul.f32 %v70_v15, %v70_v15 }
  0x27   :  { %v71_v16 = vsel %vm63_vm1, %v69_v14, 0.0 }
  0x28   :  { %v74_v18 = vmul.f32 %v71_v16, %v71_v16 }
  0x2a   :  { %v75_v19 = vadd.f32 %v74_v18, %v73_v17 }
  0x2c   :  { %v76_v20 = vrot.slane %v75_v19, 4 }
  0x2e   :  { %v77_v21 = vadd.f32 %v76_v20, %v75_v19 }
  0x30   :  { %v78_v22 = vrot.slane %v77_v21, 2 }
  0x32   :  { %v79_v23 = vadd.f32 %v78_v22, %v77_v21 }
  0x34   :  { %v80_v24 = vrot.slane %v79_v23, 1 }
  0x36   :  { %v81_v26 = vadd.f32 %v80_v24, %v79_v23 }
  0x38   :  { %v82_v27 = vadd.f32 %v81_v26, %v72_v25 }
  0x3a   :  { %83 = vst [vmem:[#allocation2] sm:$0x1] %v82_v27 }
  0x41   :  { %v87_v28 = vld [vmem:[#allocation2] sm:$0x1] }
  0x42   :  { %v89_v29 = vsel %vm88_vm2, %v87_v28, 0.0 }
  0x43   :  { %90 = vadd.xlane.f32.xlu0 %v89_v29 }
  0xcc   :  { %v91_v30 = vpop.xlane.xlu0 %90 }
  0xcd   :  { %v92_v31 = vrot.slane %v91_v30, 4 }
  0xcf   :  { %v93_v32 = vadd.f32 %v92_v31, %v91_v30 }
  0xd1   :  { %v94_v33 = vrot.slane %v93_v32, 2 }
  0xd3   :  { %v95_v34 = vadd.f32 %v94_v33, %v93_v32 }
  0xd5   :  { %v96_v35 = vrot.slane %v95_v34, 1 }
  0xd7   :  { %v97_v36 = vadd.f32 %v96_v35, %v95_v34 }
  0xd9   :  { %123 = vpush %v97_v36 }
 0x10a   :  { %s124_s2 = spop %123 }
 0x10b   :  { %s99_s25 = smul.f32 0.00048828125, %s124_s2 }
 0x10d   :  { %102 = sst [smem:[#allocation9]] %s99_s25 }
 0x10e   :  { %s105_s28 = sadd.f32 %s99_s25, %s226_s0 }
 0x110   :  { %107 = sst [smem:[#allocation9 + $0x2]] %s105_s28 }
 0x111   :  { %115 = dma.smem_to_hbm %s190_s29, 16, %s229_s3, [#allocation6]  }
 0x112   :  { %183 = dma.done.wait [#allocation6], 16  }
 0x113   :  { %184 = vsyncadd [#allocation6], 4294967280 }
 0x114   :  { %119 = sfence }
 0x115   :  { %120 = vsyncpa [#allocation5], 1 }
 0x116   :  { %121 = vsyncpa [#allocation8], 1 }
 0x117   :  { %122 = vsyncpa [#allocation6], 1 }

</bundles_post_ra>
